<compile_context>
chip_gen: v7x
topology: tpu7x:2x2x1
jax: 0.10.0
libtpu: 0.0.40
codegen_flags: <defaults>
</compile_context>

<pallas_src>
import functools
import math

import jax
import jax.numpy as jnp
from jax.experimental import pallas as pl
from jax.experimental.pallas import tpu as pltpu

D_MODEL = 32
EPS = 1e-6
DROPOUT_P = 0.1

_LANES = 128
_SUBLANES = 8
_MAX_BLOCK_BYTES = 2 << 20   # keep double-buffered blocks far below v5e's
_MAX_TILE_ROWS = 1024        # 16 MiB scoped-VMEM default


def _pick_row_tile(rows, row_bytes):
    """Largest row tile that divides `rows`, is a multiple of 8 and keeps one
    block under _MAX_BLOCK_BYTES.  Falls back to the full array (always a legal
    block shape) for tiny / odd row counts."""
    if rows <= _SUBLANES or rows % _SUBLANES != 0:
        return rows
    cap = max(_SUBLANES, min(_MAX_TILE_ROWS, _MAX_BLOCK_BYTES // max(row_bytes, 1)))
    cap = min(cap, rows)
    cap = (cap // _SUBLANES) * _SUBLANES
    for t in range(cap, _SUBLANES - 1, -_SUBLANES):
        if rows % t == 0:
            return t
    return rows


def _dropout_threshold(p):
    # keep iff bits >= threshold  =>  P(keep) = 1 - p for uniform uint32 bits.
    return jnp.uint32(min(int(p * (2.0 ** 32)), 2 ** 32 - 1))


# ------------------------------------------------------------------ fused ----
# LN(x) @ W + b, dropout, +x  -- single HBM pass over the activation.
def _fused_kernel(x_ref, g_ref, b_ref, w_ref, bias_ref, bits_ref, o_ref, *, p):
    x = x_ref[...].astype(jnp.float32)
    mean = jnp.mean(x, axis=-1, keepdims=True)
    xc = x - mean
    var = jnp.mean(xc * xc, axis=-1, keepdims=True)           # biased (PyTorch)
    ln = xc * jax.lax.rsqrt(var + EPS) * g_ref[...] + b_ref[...]
    y = jnp.dot(ln, w_ref[...].astype(jnp.float32),
                preferred_element_type=jnp.float32) + bias_ref[...]
    if p > 0.0:
        keep = bits_ref[...] >= _dropout_threshold(p)
        y = jnp.where(keep, y * jnp.float32(1.0 / (1.0 - p)), jnp.float32(0.0))
    o_ref[...] = (x + y).astype(o_ref.dtype)


def sublayer_connection_linear(x2d, gamma, beta, w, bias, bits, p, tile_rows=None):
    n, d = x2d.shape
    tn = tile_rows or _pick_row_tile(n, d * x2d.dtype.itemsize)
    row_map = lambda i: (i, 0)
    fixed = lambda i: (0, 0)
    return pl.pallas_call(
        functools.partial(_fused_kernel, p=p),
        out_shape=jax.ShapeDtypeStruct((n, d), x2d.dtype),
        grid=(n // tn,),
        in_specs=[
            pl.BlockSpec((tn, d), row_map),      # x
            pl.BlockSpec((1, d), fixed),         # gamma
            pl.BlockSpec((1, d), fixed),         # beta
            pl.BlockSpec((d, d), fixed),         # W
            pl.BlockSpec((1, d), fixed),         # bias
            pl.BlockSpec((tn, d), row_map),      # dropout bits
        ],
        out_specs=pl.BlockSpec((tn, d), row_map),
        compiler_params=pltpu.CompilerParams(dimension_semantics=("parallel",)),
    )(x2d, gamma, beta, w, bias, bits)


# ------------------------------------------------------------- LayerNorm ----
def _layernorm_kernel(x_ref, g_ref, b_ref, o_ref):
    x = x_ref[...].astype(jnp.float32)
    mean = jnp.mean(x, axis=-1, keepdims=True)
    xc = x - mean
    var = jnp.mean(xc * xc, axis=-1, keepdims=True)
    y = xc * jax.lax.rsqrt(var + EPS) * g_ref[...] + b_ref[...]
    o_ref[...] = y.astype(o_ref.dtype)


def layer_norm_pallas(x2d, gamma, beta, tile_rows=None):
    n, d = x2d.shape
    tn = tile_rows or _pick_row_tile(n, d * x2d.dtype.itemsize)
    return pl.pallas_call(
        _layernorm_kernel,
        out_shape=jax.ShapeDtypeStruct((n, d), x2d.dtype),
        grid=(n // tn,),
        in_specs=[
            pl.BlockSpec((tn, d), lambda i: (i, 0)),
            pl.BlockSpec((1, d), lambda i: (0, 0)),
            pl.BlockSpec((1, d), lambda i: (0, 0)),
        ],
        out_specs=pl.BlockSpec((tn, d), lambda i: (i, 0)),
        compiler_params=pltpu.CompilerParams(dimension_semantics=("parallel",)),
    )(x2d, gamma, beta)


# --------------------------------------------- residual + dropout (y) -------
def _residual_dropout_kernel(x_ref, y_ref, bits_ref, o_ref, *, p):
    x = x_ref[...].astype(jnp.float32)
    y = y_ref[...].astype(jnp.float32)
    if p > 0.0:
        keep = bits_ref[...] >= _dropout_threshold(p)
        y = jnp.where(keep, y * jnp.float32(1.0 / (1.0 - p)), jnp.float32(0.0))
    o_ref[...] = (x + y).astype(o_ref.dtype)


def residual_dropout_pallas(x2d, y2d, bits, p):
    n, d = x2d.shape
    # Lane-densify: purely elementwise, so view (N, d) as (N*d/128, 128) when
    # possible -> unmasked 128-lane vector loads/stores.
    if (n * d) % _LANES == 0:
        rows, cols = (n * d) // _LANES, _LANES
    else:
        rows, cols = n, d
    xd = x2d.reshape(rows, cols)
    yd = y2d.reshape(rows, cols)
    bd = bits.reshape(rows, cols)
    tn = _pick_row_tile(rows, cols * x2d.dtype.itemsize)
    out = pl.pallas_call(
        functools.partial(_residual_dropout_kernel, p=p),
        out_shape=jax.ShapeDtypeStruct((rows, cols), x2d.dtype),
        grid=(rows // tn,),
        in_specs=[
            pl.BlockSpec((tn, cols), lambda i: (i, 0)),
            pl.BlockSpec((tn, cols), lambda i: (i, 0)),
            pl.BlockSpec((tn, cols), lambda i: (i, 0)),
        ],
        out_specs=pl.BlockSpec((tn, cols), lambda i: (i, 0)),
        compiler_params=pltpu.CompilerParams(dimension_semantics=("parallel",)),
    )(xd, yd, bd)
    return out.reshape(n, d)


# --------------------------------------------------------- module wrapper ----
class SublayerConnectionPallas:
    """Pallas port of SublayerConnection(d_model, dropout).

    forward(x, sublayer) = x + dropout(sublayer(LayerNorm(x)))

    * linear=(W, b): fully fused single-kernel path (LN / matmul / dropout /
      residual stay in VMEM between stages).
    * sublayer=callable: generic path -- Pallas LayerNorm, external sublayer,
      Pallas lane-dense residual+dropout.
    Dropout is active only when a `dropout_key` is given (training mode).
    """

    def __init__(self, d_model, dropout):
        self.d_model = d_model
        self.gamma = jnp.ones((1, d_model), jnp.float32)    # nn.LayerNorm init
        self.beta = jnp.zeros((1, d_model), jnp.float32)
        self.p = float(dropout)

    def __call__(self, x, sublayer=None, *, linear=None, dropout_key=None,
                 tile_rows=None):
        orig_shape = x.shape
        d = orig_shape[-1]
        n = math.prod(orig_shape[:-1])
        x2d = x.reshape(n, d)
        p = self.p if dropout_key is not None else 0.0
        bits = (jax.random.bits(dropout_key, (n, d), jnp.uint32)
                if p > 0.0 else jnp.zeros((n, d), jnp.uint32))
        if linear is not None:
            w, b = linear
            out2d = sublayer_connection_linear(
                x2d, self.gamma, self.beta, w, b.reshape(1, d), bits, p,
                tile_rows=tile_rows)
        else:
            ln = layer_norm_pallas(x2d, self.gamma, self.beta,
                                   tile_rows=tile_rows)
            y = sublayer(ln)                                 # external callable
            out2d = residual_dropout_pallas(x2d, y.reshape(n, d), bits, p)
        return out2d.reshape(orig_shape)


# ------------------------------------------------------------- reference ----
def _reference(x, gamma, beta, w, bias, bits, p):
    b_, s_, d = x.shape
    x2d = x.reshape(b_ * s_, d).astype(jnp.float32)
    mean = jnp.mean(x2d, axis=-1, keepdims=True)
    xc = x2d - mean
    var = jnp.mean(xc * xc, axis=-1, keepdims=True)
    ln = xc * jax.lax.rsqrt(var + EPS) * gamma + beta
    y = ln @ w + bias.reshape(1, d)
    if p > 0.0:
        keep = bits >= _dropout_threshold(p)
        y = jnp.where(keep, y / (1.0 - p), 0.0)
    return (x2d + y).reshape(x.shape)


if __name__ == "__main__":
    B, S, D = 2, 8, D_MODEL
    key = jax.random.PRNGKey(0)
    kx, kw, kb, kdrop = jax.random.split(key, 4)

    x = jax.random.normal(kx, (B, S, D), dtype=jnp.float32)
    w = jax.random.normal(kw, (D, D), dtype=jnp.float32) * 0.05
    bias = jax.random.normal(kb, (D,), dtype=jnp.float32) * 0.05

    module = SublayerConnectionPallas(D_MODEL, DROPOUT_P)
    sublayer = lambda h: h @ w + bias

    # Same dropout bits the module will draw from kdrop.
    bits = jax.random.bits(kdrop, (B * S, D), jnp.uint32)
    ref = _reference(x, module.gamma, module.beta, w, bias, bits, DROPOUT_P)

    # 1) Fused single-kernel path (known linear sublayer), multi-tile grid.
    out_fused = module(x, linear=(w, bias), dropout_key=kdrop, tile_rows=8)
    out_fused = jax.block_until_ready(out_fused)
    assert out_fused.shape == (B, S, D) and out_fused.dtype == jnp.float32
    assert jnp.allclose(out_fused, ref, atol=1e-2, rtol=1e-2), "fused mismatch"

    # 2) Generic path (external sublayer callable).
    out_generic = module(x, sublayer=sublayer, dropout_key=kdrop)
    out_generic = jax.block_until_ready(out_generic)
    assert jnp.allclose(out_generic, ref, atol=1e-2, rtol=1e-2), "generic mismatch"

    # 3) Eval mode (no dropout key -> dropout disabled).
    out_eval = jax.block_until_ready(module(x, sublayer=sublayer))
    assert out_eval.shape == (B, S, D)

    print("KERNEL_OK")
</pallas_src>

<mosaic_0001>
module attributes {stable_mosaic.version = 11 : i64} {
  func.func @_fused_kernel(%arg0: i32, %arg1: memref<8x32xf32, #tpu.memory_space<vmem>>, %arg2: memref<1x32xf32, #tpu.memory_space<vmem>>, %arg3: memref<1x32xf32, #tpu.memory_space<vmem>>, %arg4: memref<32x32xf32, #tpu.memory_space<vmem>>, %arg5: memref<1x32xf32, #tpu.memory_space<vmem>>, %arg6: memref<8x32xi32, #tpu.memory_space<vmem>>, %arg7: memref<8x32xf32, #tpu.memory_space<vmem>>) attributes {dimension_semantics = [#tpu.dimension_semantics<parallel>], iteration_bounds = array<i64: 2>, scalar_prefetch = 0 : i64, scratch_operands = 0 : i64, tpu.core_type = #tpu.core_type<tc>, window_params = [{transform_indices = @transform_0, window_bounds = array<i64: 8, 32>}, {pipeline_mode = #tpu.pipeline_mode<synchronous>, transform_indices = @transform_1, window_bounds = array<i64: 1, 32>}, {pipeline_mode = #tpu.pipeline_mode<synchronous>, transform_indices = @transform_2, window_bounds = array<i64: 1, 32>}, {pipeline_mode = #tpu.pipeline_mode<synchronous>, transform_indices = @transform_3, window_bounds = array<i64: 32, 32>}, {pipeline_mode = #tpu.pipeline_mode<synchronous>, transform_indices = @transform_4, window_bounds = array<i64: 1, 32>}, {transform_indices = @transform_5, window_bounds = array<i64: 8, 32>}, {transform_indices = @transform_6, window_bounds = array<i64: 8, 32>}]} {
    %c0 = arith.constant 0 : index
    %c0_0 = arith.constant 0 : index
    %0 = vector.load %arg1[%c0, %c0_0] : memref<8x32xf32, #tpu.memory_space<vmem>>, vector<8x32xf32>
    %cst = arith.constant dense<0.000000e+00> : vector<8xf32>
    %1 = vector.multi_reduction <add>, %0, %cst [1] : vector<8x32xf32> to vector<8xf32>
    %2 = vector.shape_cast %1 : vector<8xf32> to vector<8x1xf32>
    %cst_1 = arith.constant 3.200000e+01 : f32
    %3 = vector.broadcast %cst_1 : f32 to vector<8x1xf32>
    %4 = arith.divf %2, %3 : vector<8x1xf32>
    %5 = vector.broadcast %4 : vector<8x1xf32> to vector<8x32xf32>
    %6 = arith.subf %0, %5 : vector<8x32xf32>
    %7 = arith.mulf %6, %6 : vector<8x32xf32>
    %cst_2 = arith.constant dense<0.000000e+00> : vector<8xf32>
    %8 = vector.multi_reduction <add>, %7, %cst_2 [1] : vector<8x32xf32> to vector<8xf32>
    %9 = vector.shape_cast %8 : vector<8xf32> to vector<8x1xf32>
    %cst_3 = arith.constant 3.200000e+01 : f32
    %10 = vector.broadcast %cst_3 : f32 to vector<8x1xf32>
    %11 = arith.divf %9, %10 : vector<8x1xf32>
    %cst_4 = arith.constant 9.99999997E-7 : f32
    %12 = vector.broadcast %cst_4 : f32 to vector<8x1xf32>
    %13 = arith.addf %11, %12 : vector<8x1xf32>
    %14 = math.rsqrt %13 : vector<8x1xf32>
    %15 = vector.broadcast %14 : vector<8x1xf32> to vector<8x32xf32>
    %16 = arith.mulf %6, %15 : vector<8x32xf32>
    %c0_5 = arith.constant 0 : index
    %c0_6 = arith.constant 0 : index
    %17 = vector.load %arg2[%c0_5, %c0_6] : memref<1x32xf32, #tpu.memory_space<vmem>>, vector<1x32xf32>
    %18 = vector.broadcast %17 : vector<1x32xf32> to vector<8x32xf32>
    %19 = arith.mulf %16, %18 : vector<8x32xf32>
    %c0_7 = arith.constant 0 : index
    %c0_8 = arith.constant 0 : index
    %20 = vector.load %arg3[%c0_7, %c0_8] : memref<1x32xf32, #tpu.memory_space<vmem>>, vector<1x32xf32>
    %21 = vector.broadcast %20 : vector<1x32xf32> to vector<8x32xf32>
    %22 = arith.addf %19, %21 : vector<8x32xf32>
    %c0_9 = arith.constant 0 : index
    %c0_10 = arith.constant 0 : index
    %23 = vector.load %arg4[%c0_9, %c0_10] : memref<32x32xf32, #tpu.memory_space<vmem>>, vector<32x32xf32>
    %cst_11 = arith.constant dense<0.000000e+00> : vector<8x32xf32>
    %24 = tpu.matmul %22, %23, %cst_11 {dimension_numbers = #tpu.dot_dimension_numbers<[1], [0], [0], [1], [0, 0, 1, 1], [], []>} : vector<8x32xf32>, vector<32x32xf32>, vector<8x32xf32> -> vector<8x32xf32>
    %c0_12 = arith.constant 0 : index
    %c0_13 = arith.constant 0 : index
    %25 = vector.load %arg5[%c0_12, %c0_13] : memref<1x32xf32, #tpu.memory_space<vmem>>, vector<1x32xf32>
    %26 = vector.broadcast %25 : vector<1x32xf32> to vector<8x32xf32>
    %27 = arith.addf %24, %26 : vector<8x32xf32>
    %c0_14 = arith.constant 0 : index
    %c0_15 = arith.constant 0 : index
    %28 = vector.load %arg6[%c0_14, %c0_15] : memref<8x32xi32, #tpu.memory_space<vmem>>, vector<8x32xi32>
    %c429496729_i32 = arith.constant 429496729 : i32
    %29 = vector.broadcast %c429496729_i32 : i32 to vector<8x32xi32>
    %30 = arith.cmpi uge, %28, %29 : vector<8x32xi32>
    %cst_16 = arith.constant 1.11111116 : f32
    %31 = vector.broadcast %cst_16 : f32 to vector<8x32xf32>
    %32 = arith.mulf %27, %31 : vector<8x32xf32>
    %cst_17 = arith.constant 0.000000e+00 : f32
    %33 = vector.broadcast %cst_17 : f32 to vector<8x32xf32>
    %34 = arith.select %30, %32, %33 : vector<8x32xi1>, vector<8x32xf32>
    %35 = arith.addf %0, %34 : vector<8x32xf32>
    %c0_18 = arith.constant 0 : index
    %c0_19 = arith.constant 0 : index
    %36 = vector.load %arg7[%c0_18, %c0_19] : memref<8x32xf32, #tpu.memory_space<vmem>>, vector<8x32xf32>
    tpu.vector_store %arg7[%c0_18, %c0_19], %35 {strides = array<i32>} : memref<8x32xf32, #tpu.memory_space<vmem>>, vector<8x32xf32>,
    return
  }
  func.func @transform_0(%arg0: i32) -> (i32, i32) {
    %c0_i32 = arith.constant 0 : i32
    %c0_i32_0 = arith.constant 0 : i32
    return %arg0, %c0_i32 : i32, i32
  }
  func.func @transform_1(%arg0: i32) -> (i32, i32) {
    %c0_i32 = arith.constant 0 : i32
    %c0_i32_0 = arith.constant 0 : i32
    %c0_i32_1 = arith.constant 0 : i32
    return %c0_i32, %c0_i32_0 : i32, i32
  }
  func.func @transform_2(%arg0: i32) -> (i32, i32) {
    %c0_i32 = arith.constant 0 : i32
    %c0_i32_0 = arith.constant 0 : i32
    %c0_i32_1 = arith.constant 0 : i32
    return %c0_i32, %c0_i32_0 : i32, i32
  }
  func.func @transform_3(%arg0: i32) -> (i32, i32) {
    %c0_i32 = arith.constant 0 : i32
    %c0_i32_0 = arith.constant 0 : i32
    %c0_i32_1 = arith.constant 0 : i32
    return %c0_i32, %c0_i32_0 : i32, i32
  }
  func.func @transform_4(%arg0: i32) -> (i32, i32) {
    %c0_i32 = arith.constant 0 : i32
    %c0_i32_0 = arith.constant 0 : i32
    %c0_i32_1 = arith.constant 0 : i32
    return %c0_i32, %c0_i32_0 : i32, i32
  }
  func.func @transform_5(%arg0: i32) -> (i32, i32) {
    %c0_i32 = arith.constant 0 : i32
    %c0_i32_0 = arith.constant 0 : i32
    return %arg0, %c0_i32 : i32, i32
  }
  func.func @transform_6(%arg0: i32) -> (i32, i32) {
    %c0_i32 = arith.constant 0 : i32
    %c0_i32_0 = arith.constant 0 : i32
    return %arg0, %c0_i32 : i32, i32
  }
}

</mosaic_0001>

<bundles_post_ra>
// kernel: tpu_custom_call.1
= control target key start
LH: loop header
LB: loop body
LE: loop exit
PB: predicated region body
PF: predicated region fallthrough
CT: control target
= control target key end

     0   :  { %11 = vsyncpa [#allocation3], 0  ;;  %s1116_s0 = inlined_call_operand.hbm [shape: f32[16,32], index: 0, kind: input, shape index: {}]   ;;  %s1117_s1 = inlined_call_operand.vmem [shape: f32[1,32], index: 1, kind: input, shape index: {}]   ;;  %s1118_s2 = inlined_call_operand.vmem [shape: f32[1,32], index: 2, kind: input, shape index: {}]   ;;  %s1119_s3 = inlined_call_operand.hbm [shape: f32[32,32], index: 3, kind: input, shape index: {}]   ;;  %s1120_s4 = inlined_call_operand.hbm [shape: f32[1,32], index: 4, kind: input, shape index: {}]   ;;  %s1121_s5 = inlined_call_operand.vmem [shape: u32[16,32], index: 5, kind: input, shape index: {}]   ;;  %s1122_s6 = inlined_call_operand.hbm [shape: f32[16,32], index: 6, kind: output, shape index: {}]  }
   0x1   :  { %13 = vsyncpa [#allocation3 + $0x1], 0 }
   0x2   :  { %14 = vsyncpa [#allocation6], 0 }
   0x3   :  { %15 = vsyncpa [#allocation4], 0 }
   0x4   :  { %17 = vsyncpa [#allocation4 + $0x1], 0  ;;  %s867_s21 = smov 0   ;;  %s869_s22 = smov 0  }
   0x5   :  { %s871_s23 = smov 0   ;;  %s873_s24 = smov 0  }
   0x6 LB: > { %s888_s25 = sadd.s32 4294967295, %s821_s24   ;;  %s548_s26 = sadd.s32 4294967294, %s821_s24   ;;  %s821_s24 = sphi %s873_s24, %s1142_s24   ;;  %s817_s23 = sphi %s871_s23, %s1141_s23   ;;  %s813_s22 = sphi %s869_s22, %s1140_s22   ;;  %s809_s21 = sphi %s867_s21, %s1139_s21  }
   0x7   : > { %p43_p0 = scmp.ne.s32.totalorder %s813_s22, %s809_s21  ;;  %p1123_p1 = scmp.eq.s32.totalorder %s888_s25, 0 }
   0x8   : > { %p183_p3 = scmp.eq.s32.totalorder %s548_s26, 1  ;;  %p549_p5 = scmp.ge.s32.totalorder %s821_s24, 1 }
   0x9   : > { %p897_p4 = por %p1123_p1, %p43_p0  ;;  %p190_p7 = scmp.lt.s32.totalorder %s821_s24, 3 }
   0xa   : > { %p902_p6 = por %p183_p3, %p43_p0  ;;  %s823_s30 = smov [#allocation5]  }
   0xb   : > { %s1126_s27 = scalar_select %p897_p4, 1, 0 }
   0xc   : > { %s1127_s28 = scalar_select %p902_p6, 1, 0 }
   0xd   : > { %p907_p8 = pnand %p549_p5, %p190_p7  ;;  %s208_s7 = sshll.u32 %s823_s30, 4  ;;  %s911_s7 = int_to_ptr.vmem [resolvable:$true] %s208_s7 }
   0xe   : > { %s824_s9 = smov [#allocation7]   ;;  %s665_s13 = scalar_lea.hbm %s1119_s3, 512 }
   0xf   : > { %p603_p9 = pneg %p907_p8  ;;  %s222_s10 = sshll.u32 %s824_s9, 4  ;;  %s922_s10 = int_to_ptr.vmem [resolvable:$true] %s222_s10 }
  0x10   : > { %p666_p12 = scmp.ne.s32.totalorder %s1119_s3, %s665_s13  ;;  %p672_p5 = scmp.lt.u32.totalorder %s665_s13, %s1119_s3 }
  0x11   : > { %p918_p11 = pnand %p603_p9, %p1123_p1 }
  0x13   : > { %p667_p13 = pneg %p918_p11 }
  0x15   : > { %p668_p0 = pnand %p667_p13, %p666_p12 }
  0x17   : > { %p669_p3 = pneg %p668_p0 }
  0x19   : > { %p674_p7 = pnand %p672_p5, %p669_p3 }
  0x1b   : > { %677 = shalt.err (!%p674_p7)
}
  0x1c   : > { %s678_s18 = scalar_lea.vmem %s911_s7, 512  ;;  %p686_p2 = scmp.lt.s32.totalorder %s911_s7, %s911_s7 }
  0x1d   : > { %p679_p9 = scmp.ne.s32.totalorder %s911_s7, %s678_s18  ;;  %p687_p12 = scmp.lt.s32.totalorder %s678_s18, %s678_s18 }
  0x1f   : > { %p681_p10 = pnand %p679_p9, %p667_p13  ;;  %p688_p0 = por %p687_p12, %p686_p2 }
  0x21   : > { %p682_p1 = pneg %p681_p10 }
  0x23   : > { %p689_p6 = pnand %p688_p0, %p682_p1 }
  0x25   : > { %692 = shalt.err (!%p689_p6)
}
  0x26   : > { %s825_s19 = smov 128   ;;  %s826_s20 = smov 8  }
  0x27   : > { %606 = dma.hbm_to_vmem [thread:$0]  (!%p918_p11), %s1119_s3, 512, %s911_s7, [#allocation6], %s825_s19, %s825_s19, %s826_s20  }
  0x28   : > { %s693_s12 = scalar_lea.hbm %s1120_s4, 16 }
  0x29   : > { %p694_p2 = scmp.ne.s32.totalorder %s1120_s4, %s693_s12  ;;  %p700_p10 = scmp.lt.u32.totalorder %s693_s12, %s1120_s4 }
  0x2b   : > { %p696_p1 = pnand %p694_p2, %p667_p13 }
  0x2d   : > { %p697_p6 = pneg %p696_p1 }
  0x2f   : > { %p702_p3 = pnand %p700_p10, %p697_p6 }
  0x31   : > { %705 = shalt.err (!%p702_p3)
}
  0x32   : > { %s706_s7 = scalar_lea.vmem %s922_s10, 16  ;;  %s713_s17 = scalar_lea.vmem %s922_s10, 32 }
  0x33   : > { %p707_p5 = scmp.ne.s32.totalorder %s922_s10, %s706_s7  ;;  %p714_p12 = scmp.lt.s32.totalorder %s922_s10, %s922_s10 }
  0x34   : > { %p715_p0 = scmp.lt.s32.totalorder %s713_s17, %s706_s7 }
  0x35   : > { %p709_p7 = pnand %p707_p5, %p667_p13 }
  0x36   : > { %p716_p2 = por %p715_p0, %p714_p12 }
  0x37   : > { %p710_p9 = pneg %p709_p7 }
  0x39   : > { %p717_p1 = pnand %p716_p2, %p710_p9 }
  0x3b   : > { %720 = shalt.err (!%p717_p1)
}
  0x3c   : > { %609 = dma.hbm_to_vmem [thread:$0]  (!%p918_p11), %s1120_s4, 16, %s922_s10, [#allocation6]  }
  0x3d   : > { %s978_s20 = sadd.s32 1, %s821_s24   ;;  %s30_s8 = sadd.s32 1, %s817_s23 }
  0x3e   : > { %s27_s26 = ssub.s32 %s821_s24, %s978_s20  ;;  %p37_p13 = scmp.ne.s32.totalorder %s817_s23, %s813_s22 }
  0x3f   : > { %p28_p6 = scmp.eq.s32.totalorder %s27_s26, 0  ;;  %p38_p10 = scmp.eq.s32.totalorder %s821_s24, 0 }
  0x40   : > { %p1130_p3 = scmp.eq.s32.totalorder %s888_s25, 1  ;;  %p620_p7 = scmp.lt.s32.totalorder %s821_s24, 2 }
  0x41   : > { %s994_s9 = scalar_select %p28_p6, %s817_s23, %s30_s8  }
  0x42   : > { %p988_p5 = por %p1130_p3, %p37_p13  ;;  %p39_p9 = por %p38_p10, %p37_p13 }
  0x43   : > { %s233_s11 = sand.u32 1, %s817_s23   ;;  %s554_s10 = sshll.u32 %s821_s24, 7 }
  0x44   : > { %s1131_s30 = scalar_select %p988_p5, 1, 0 }
  0x45   : > { %s553_s12 = sshll.u32 %s233_s11, 3  ;;  %s1001_s15 = scalar_lea.hbm %s1116_s0, %s554_s10 }
  0x46   : > { %s237_s16 = scalar_lea.vmem [#allocation2], %s553_s12  ;;  %p1005_p11 = pnand %p620_p7, %p39_p9 }
  0x47   : > { %s244_s7 = sshll.u32 %s237_s16, 4  ;;  %s234_s18 = scalar_lea.sflag [#allocation3], %s233_s11  ;;  %s1003_s7 = int_to_ptr.vmem [resolvable:$true] %s244_s7 }
  0x48   : > { %s721_s19 = scalar_lea.hbm %s1001_s15, 128  ;;  %p723_p0 = pneg %p1005_p11 }
  0x49   : > { %p722_p12 = scmp.ne.s32.totalorder %s1001_s15, %s721_s19  ;;  %s726_s12 = scalar_lea.hbm %s1116_s0, 256 }
  0x4a   : > { %p727_p13 = scmp.lt.u32.totalorder %s1001_s15, %s1116_s0  ;;  %p728_p6 = scmp.lt.u32.totalorder %s726_s12, %s721_s19 }
  0x4b   : > { %p724_p2 = pnand %p723_p0, %p722_p12  ;;  %p730_p3 = scmp.lt.u32.totalorder %s721_s19, %s1001_s15 }
  0x4c   : > { %p729_p10 = por %p728_p6, %p727_p13 }
  0x4d   : > { %p725_p1 = pneg %p724_p2 }
  0x4e   : > { %p731_p7 = por %p730_p3, %p729_p10 }
  0x50   : > { %p732_p9 = pnand %p731_p7, %p725_p1 }
  0x52   : > { %735 = shalt.err (!%p732_p9)
}
  0x53   : > { %s736_s11 = scalar_lea.vmem %s1003_s7, 128  ;;  %s827_s14 = smov [#allocation2]  }
  0x54   : > { %p737_p12 = scmp.ne.s32.totalorder %s1003_s7, %s736_s11  ;;  %s741_s16 = sshll.u32 %s827_s14, 4  ;;  %s742_s16 = int_to_ptr.vmem [resolvable:$false] %s741_s16 }
  0x55   : > { %s743_s8 = scalar_lea.vmem %s742_s16, 256  ;;  %p744_p4 = scmp.lt.s32.totalorder %s1003_s7, %s742_s16 }
  0x56   : > { %p739_p2 = pnand %p737_p12, %p723_p0  ;;  %p745_p13 = scmp.lt.s32.totalorder %s743_s8, %s736_s11 }
  0x58   : > { %p740_p5 = pneg %p739_p2  ;;  %p746_p6 = por %p745_p13, %p744_p4 }
  0x5a   : > { %p747_p10 = pnand %p746_p6, %p740_p5 }
  0x5c   : > { %750 = shalt.err (!%p747_p10)
}
  0x5d   : > { %613 = dma.hbm_to_vmem [thread:$0]  (!%p1005_p11), %s1001_s15, 128, %s1003_s7, %s234_s18  }
  0x5e   : > { %260 = sbr.rel (%p907_p8) target bundleno = 652 (0x28c), region = 44  ;;  %s1037_s19 = sand.u32 (!%p907_p8), 1, %s813_s22  }
  0x5f   : > { %s556_s26 = sshll.u32 (!%p907_p8), %s1037_s19, 3  ;;  %s263_s12 = scalar_lea.sflag (!%p907_p8), [#allocation3], %s1037_s19 }
  0x60   : > { %s266_s10 = scalar_lea.vmem (!%p907_p8), [#allocation2], %s556_s26  ;;  %p1133_p4 = scmp.ne.s32.totalorder (!%p907_p8), %s1126_s27, 0 }
  0x65   : > { %796 = dma.done.wait (%p1133_p4), %s263_s12, 128  }
  0x66   : > { %798 = vsyncadd (%p1133_p4), %s263_s12, 4294967168  ;;  %p1134_p5 = scmp.eq.s32.totalorder %s888_s25, 0 }
  0x68   : > { %800 = dma.done.wait (%p1134_p5), [#allocation6], 528   ;;  %p1135_p8 = pmov %p1134_p5 }
  0x69   : > { %vm312_vm0 = vcmask 261120   ;;  %v311_v0 = vld [vmem:[%s266_s10] sm:$0xff]  ;;  %v343_v7 = vld [vmem:[#allocation5] sm:$0xff]  ;;  %v344_v8 = vld [vmem:[#allocation5 + $0x8] sm:$0xff]  ;;  %v828_v10 = vmov 0.0|0.0   ;;  %vm829_vm1 = vmmov 0  }
  0x6a   : > { %802 = vsyncadd (%p1135_p8), [#allocation6], 4294966768  ;;  %v313_v1 = vsel %vm312_vm0, %v311_v0, 0.0  ;;  %v345_v9 = vld [vmem:[#allocation5 + $0x10] sm:$0xff]  ;;  %585 = vmatprep.subr.bf16.mxu0 %v828_v10  ;;  %v586_v11 = vpack.c.bf16 %v344_v8, %v343_v7  ;;  %v346_v12 = vld [vmem:[#allocation5 + $0x18] sm:$0xff]  ;;  %v830_v13 = vmov 0.0  }
  0x6b   : > { %314 = vadd.xlane.f32.xlu0 %v313_v1  ;;  %582 = vmatprep.mubr.msk.f32.mxu0 %vm829_vm1, %v830_v13  ;;  %v589_v14 = vpack.c.bf16 %v346_v12, %v345_v9  ;;  %v561_v19 = vld [vmem:[%s1117_s1] ss:$0 sm:$0xff]  ;;  %p307_p11 = scmp.lt.s32.totalorder %s888_s25, 1  ;;  %v563_v24 = vld [vmem:[#allocation7] ss:$0 sm:$0xff]  ;;  %s566_s16 = sshll.u32 %s888_s25, 7 }
  0x6c   : > { %587 = vmatpush3.bf16.msra.mxu0 %v586_v11  ;;  %v562_v21 = vld [vmem:[%s1118_s2] ss:$0 sm:$0xff]  ;;  %s306_s8 = scalar_lea.vmem [#allocation8], %s556_s26  ;;  %s1071_s29 = scalar_lea.hbm %s1122_s6, %s566_s16 }
  0x6d   : > { %588 = vmatprep.subr.bf16.mxu0 %v828_v10  ;;  %s308_s17 = scalar_select %p307_p11, %s888_s25, 1 }
  0x6e   : > { %s447_s12 = sshll.u32 %s306_s8, 4  ;;  %s434_s15 = scalar_lea.sflag [#allocation4], %s1037_s19  ;;  %s1073_s12 = int_to_ptr.vmem [resolvable:$true] %s447_s12 }
  0x6f   : > { %s560_s18 = sshll.u32 %s308_s17, 3  ;;  %s751_s7 = scalar_lea.vmem %s1073_s12, 128 }
  0x70   : > { %590 = vmatpush3.bf16.msra.mxu0 %v589_v14  ;;  %s310_s14 = scalar_lea.vmem %s1121_s5, %s560_s18  ;;  %p752_p0 = scmp.ne.s32.totalorder %s1073_s12, %s751_s7 }
  0x71   : > { %v427_v25 = vld [vmem:[%s310_s14] sm:$0xff]  ;;  %p1136_p1 = scmp.ne.s32.totalorder %s1131_s30, 0  ;;  %s831_s25 = smov [#allocation8]  }
  0x72   : > { %vm428_vm2 = vcmp.ge.u32.totalorder %v427_v25, 429496729  ;;  %s755_s26 = sshll.u32 %s831_s25, 4  ;;  %s756_s26 = int_to_ptr.vmem [resolvable:$false] %s755_s26 }
  0x73   : > { %p753_p3 = pnand %p752_p0, %p1136_p1  ;;  %s757_s17 = scalar_lea.vmem %s756_s26, 256 }
  0x74   : > { %p758_p9 = scmp.lt.s32.totalorder %s1073_s12, %s756_s26  ;;  %p759_p12 = scmp.lt.s32.totalorder %s757_s17, %s751_s7 }
  0x75   : > { %p754_p7 = pneg %p753_p3 }
  0x76   : > { %p760_p2 = por %p759_p12, %p758_p9 }
  0x78   : > { %p761_p13 = pnand %p760_p2, %p754_p7 }
  0xf8   : > { %v315_v2 = vpop.xlane.xlu0 %314 }
  0xf9   : > { %v317_v3 = vmul.f32 0.03125, %v315_v2 }
  0xfb   : > { %v318_v4 = vsub.f32 %v311_v0, %v317_v3 }
  0xfd   : > { %v319_v5 = vmul.f32 %v318_v4, %v318_v4 }
  0xff   : > { %v320_v6 = vsel %vm312_vm0, %v319_v5, 0.0 }
 0x100   : > { %321 = vadd.xlane.f32.xlu0 %v320_v6 }
 0x18d   : > { %v322_v15 = vpop.xlane.xlu0 %321 }
 0x18e   : > { %v323_v16 = vmul.f32 0.03125, %v322_v15 }
 0x190   : > { %v324_v17 = vadd.f32 1e-06, %v323_v16 }
 0x192   : > { %663 = vrsqrt.f32 %v324_v17 }
 0x19c   : > { %v664_v18 = vpop.eup %663 }
 0x19d   : > { %v326_v20 = vmul.f32 %v664_v18, %v318_v4 }
 0x19f   : > { %v334_v22 = vmul.f32 %v561_v19, %v326_v20 }
 0x1a1   : > { %v342_v23 = vadd.f32 %v562_v21, %v334_v22 }
 0x1a3   : > { %583 = vmatmul.mubr.msk.f32.vlgmr.msra.gmra.mrb[0].mxu0 %vm312_vm0, %v342_v23 }
 0x276   : > { %v423_v26 = vpop.f32.mrb[0].mxu0 }
 0x277   : > { %v424_v27 = vadd.f32 %v563_v24, %v423_v26  ;;  %v584_v28 = vpop.f32.mrb[1].mxu0 }
 0x279   : > { %v429_v29 = vmul.f32 1.1111112, %v424_v27 }
 0x27b   : > { %v430_v30 = vsel %vm428_vm2, %v429_v29, 0.0 }
 0x27c   : > { %v431_v31 = vadd.f32 %v430_v30, %v311_v0 }
 0x27e   : > { %432 = vst.msk [vmem:[%s306_s8] sm:$0xff] %vm312_vm0, %v431_v31 }
 0x27f   : > { %764 = shalt.err (!%p761_p13)
}
 0x280   : > { %s765_s19 = scalar_lea.hbm %s1071_s29, 128  ;;  %s769_s11 = scalar_lea.hbm %s1122_s6, 256 }
 0x281   : > { %p766_p6 = scmp.ne.s32.totalorder %s1071_s29, %s765_s19  ;;  %p770_p5 = scmp.lt.u32.totalorder %s1071_s29, %s1122_s6 }
 0x282   : > { %p771_p8 = scmp.lt.u32.totalorder %s769_s11, %s765_s19  ;;  %p773_p0 = scmp.lt.u32.totalorder %s765_s19, %s1071_s29 }
 0x283   : > { %p767_p10 = pnand %p766_p6, %p1136_p1 }
 0x284   : > { %p772_p11 = por %p771_p8, %p770_p5 }
 0x285   : > { %p768_p4 = pneg %p767_p10 }
 0x286   : > { %p774_p3 = por %p773_p0, %p772_p11 }
 0x288   : > { %p775_p7 = pnand %p774_p3, %p768_p4 }
 0x28a   : > { %778 = shalt.err (!%p775_p7)
}
 0x28b   : > { %601 = dma.vmem_to_hbm [thread:$0]  (%p1136_p1), %s1073_s12, 128, %s1071_s29, %s434_s15  }
 0x28c PF: > { %s459_s8 = sand.u32 1, %s809_s21   ;;  %p1137_p9 = scmp.ne.s32.totalorder %s1127_s28, 0 }
 0x28d   : > { %p1138_p12 = scmp.ge.s32.totalorder %s821_s24, 2  ;;  %s460_s10 = scalar_lea.sflag [#allocation4], %s459_s8 }
 0x28f   : > { %p615_p2 = pnand %p1138_p12, %p1137_p9 }
 0x291   : > { %804 = dma.done.wait (!%p615_p2), %s460_s10, 128  }
 0x292   : > { %806 = vsyncadd (!%p615_p2), %s460_s10, 4294967168  ;;  %p20_p13 = scmp.ge.s32.totalorder %s978_s20, 4   ;;  %s1139_s21 = smov %s813_s22 }
 0x293   : > { %s1140_s22 = smov %s817_s23  ;;  %s1141_s23 = smov %s994_s9 }
 0x294   : > { %s1142_s24 = smov %s978_s20  ;;  %22 = sbr.rel (!%p20_p13) target bundleno = 6 (0x6), region = 100 }
 0x29b   :  { %465 = vsyncpa [#allocation3], 1 }
 0x29c   :  { %467 = vsyncpa [#allocation3 + $0x1], 1 }
 0x29d   :  { %468 = vsyncpa [#allocation6], 1 }
 0x29e   :  { %469 = vsyncpa [#allocation4], 1 }
 0x29f   :  { %471 = vsyncpa [#allocation4 + $0x1], 1 }

</bundles_post_ra>
